<compile_context>
chip_gen: v7x
topology: tpu7x:2x2x1
jax: 0.10.0
libtpu: 0.0.40
codegen_flags: <defaults>
</compile_context>

<pallas_src>
import jax
import jax.numpy as jnp
from jax.experimental import pallas as pl
from jax.experimental.pallas import tpu as pltpu


def _bi_interaction_kernel(x_ref, o_ref):
    # x_ref block: (TB, F, D); o_ref block: (TB, D)
    x = x_ref[...].astype(jnp.float32)
    s = jnp.sum(x, axis=1)                      # (TB, D)  sum over fields
    sum_of_square = jnp.sum(x * x, axis=1)      # (TB, D)
    o_ref[...] = (0.5 * (s * s - sum_of_square)).astype(o_ref.dtype)


def _round_up(n, m):
    return ((n + m - 1) // m) * m


def bi_interaction_pooling(x, *, block_bytes=4 << 20):
    """x: (B, F, D) -> (B, 1, D). Equivalent to BiInteractionPooling.forward."""
    B, F, D = x.shape
    itemsize = jnp.dtype(x.dtype).itemsize
    row_bytes = F * D * itemsize

    # Target ~block_bytes per input block; TB a multiple of 8 (dense sublane
    # stores), never padding the batch by more than one tile's worth of rows.
    tb = max(8, (block_bytes // row_bytes) // 8 * 8)
    tb = min(tb, _round_up(B, 8))
    b_pad = pl.cdiv(B, tb) * tb

    if b_pad != B:
        x = jnp.pad(x, ((0, b_pad - B), (0, 0), (0, 0)))

    out = pl.pallas_call(
        _bi_interaction_kernel,
        out_shape=jax.ShapeDtypeStruct((b_pad, D), x.dtype),
        grid_spec=pltpu.PrefetchScalarGridSpec(
            num_scalar_prefetch=0,
            grid=(b_pad // tb,),
            in_specs=[pl.BlockSpec((tb, F, D), lambda b: (b, 0, 0))],
            out_specs=pl.BlockSpec((tb, D), lambda b: (b, 0)),
        ),
        compiler_params=pltpu.CompilerParams(
            dimension_semantics=("parallel",),
            vmem_limit_bytes=64 << 20,
        ),
    )(x)

    # Restore keepdim axis and drop padded rows outside the kernel.
    return out[:B].reshape(B, 1, D)


def bi_interaction_pooling_ref(x):
    """Pure-JAX reference matching the PyTorch semantics exactly."""
    square_of_sum = jnp.square(jnp.sum(x, axis=1, keepdims=True))
    sum_of_square = jnp.sum(x * x, axis=1, keepdims=True)
    return 0.5 * (square_of_sum - sum_of_square)


if __name__ == "__main__":
    key = jax.random.PRNGKey(0)
    B, F, D = 2, 4, 32  # batch=2, num_fields=4, embedding_dim=32
    x = jax.random.normal(key, (B, F, D), dtype=jnp.float32)

    out = bi_interaction_pooling(x)
    out = jax.block_until_ready(out)

    ref = bi_interaction_pooling_ref(x)
    assert out.shape == (B, 1, D)
    assert jnp.allclose(out, ref, atol=1e-5, rtol=1e-5)

    # A second, larger (still small) shape to exercise multi-tile + padding.
    B2, F2, D2 = 70, 8, 128
    x2 = jax.random.normal(jax.random.PRNGKey(1), (B2, F2, D2), dtype=jnp.float32)
    out2 = jax.block_until_ready(bi_interaction_pooling(x2, block_bytes=1 << 15))
    assert out2.shape == (B2, 1, D2)
    assert jnp.allclose(out2, bi_interaction_pooling_ref(x2), atol=1e-5, rtol=1e-5)

    print("KERNEL_OK")
</pallas_src>

<mosaic_0001>
module attributes {stable_mosaic.version = 11 : i64} {
  func.func @_bi_interaction_kernel(%arg0: i32, %arg1: memref<8x4x32xf32, #tpu.memory_space<vmem>>, %arg2: memref<8x32xf32, #tpu.memory_space<vmem>>) attributes {dimension_semantics = [#tpu.dimension_semantics<parallel>], iteration_bounds = array<i64: 1>, scalar_prefetch = 0 : i64, scratch_operands = 0 : i64, tpu.core_type = #tpu.core_type<tc>, window_params = [{transform_indices = @transform_0, window_bounds = array<i64: 8, 4, 32>}, {transform_indices = @transform_1, window_bounds = array<i64: 8, 32>}]} {
    %c0 = arith.constant 0 : index
    %c0_0 = arith.constant 0 : index
    %c0_1 = arith.constant 0 : index
    %0 = vector.load %arg1[%c0, %c0_0, %c0_1] : memref<8x4x32xf32, #tpu.memory_space<vmem>>, vector<8x4x32xf32>
    %cst = arith.constant dense<0.000000e+00> : vector<8x32xf32>
    %1 = vector.multi_reduction <add>, %0, %cst [1] : vector<8x4x32xf32> to vector<8x32xf32>
    %2 = arith.mulf %0, %0 : vector<8x4x32xf32>
    %cst_2 = arith.constant dense<0.000000e+00> : vector<8x32xf32>
    %3 = vector.multi_reduction <add>, %2, %cst_2 [1] : vector<8x4x32xf32> to vector<8x32xf32>
    %4 = arith.mulf %1, %1 : vector<8x32xf32>
    %5 = arith.subf %4, %3 : vector<8x32xf32>
    %cst_3 = arith.constant 5.000000e-01 : f32
    %6 = vector.broadcast %cst_3 : f32 to vector<8x32xf32>
    %7 = arith.mulf %6, %5 : vector<8x32xf32>
    %c0_4 = arith.constant 0 : index
    %c0_5 = arith.constant 0 : index
    %8 = vector.load %arg2[%c0_4, %c0_5] : memref<8x32xf32, #tpu.memory_space<vmem>>, vector<8x32xf32>
    tpu.vector_store %arg2[%c0_4, %c0_5], %7 {strides = array<i32>} : memref<8x32xf32, #tpu.memory_space<vmem>>, vector<8x32xf32>,
    return
  }
  func.func @transform_0(%arg0: i32) -> (i32, i32, i32) {
    %c0_i32 = arith.constant 0 : i32
    %c0_i32_0 = arith.constant 0 : i32
    %c0_i32_1 = arith.constant 0 : i32
    return %arg0, %c0_i32, %c0_i32_0 : i32, i32, i32
  }
  func.func @transform_1(%arg0: i32) -> (i32, i32) {
    %c0_i32 = arith.constant 0 : i32
    %c0_i32_0 = arith.constant 0 : i32
    return %arg0, %c0_i32 : i32, i32
  }
}

</mosaic_0001>

<bundles_post_ra>
// kernel: tpu_custom_call.1
= control target key start
LH: loop header
LB: loop body
LE: loop exit
PB: predicated region body
PF: predicated region fallthrough
CT: control target
= control target key end

     0   :  { %6 = vsyncpa [#allocation3], 0  ;;  %s360_s0 = inlined_call_operand.hbm [shape: f32[8,4,32], index: 0, kind: input, shape index: {}]   ;;  %s361_s1 = inlined_call_operand.hbm [shape: f32[8,32], index: 1, kind: output, shape index: {}]  }
   0x1   :  { %7 = vsyncpa [#allocation4], 0  ;;  %s268_s6 = smov [#allocation2]   ;;  %s220_s10 = scalar_lea.hbm %s360_s0, 512 }
   0x2   :  { %s13_s7 = sshll.u32 %s268_s6, 4  ;;  %p221_p0 = scmp.ne.s32.totalorder %s360_s0, %s220_s10  ;;  %s14_s7 = int_to_ptr.vmem [resolvable:$true] %s13_s7 }
   0x3   :  { %p224_p1 = scmp.lt.u32.totalorder %s220_s10, %s360_s0 }
   0x5   :  { %p226_p2 = pnand %p224_p1, %p221_p0 }
   0x7   :  { %229 = shalt.err (!%p226_p2)
}
   0x8   :  { %s230_s15 = scalar_lea.vmem %s14_s7, 512  ;;  %p235_p4 = scmp.lt.s32.totalorder %s14_s7, %s14_s7 }
   0x9   :  { %p231_p3 = scmp.ne.s32.totalorder %s14_s7, %s230_s15  ;;  %p236_p5 = scmp.lt.s32.totalorder %s230_s15, %s230_s15 }
   0xb   :  { %p237_p6 = por %p236_p5, %p235_p4 }
   0xd   :  { %p238_p7 = pnand %p237_p6, %p231_p3 }
   0xf   :  { %241 = shalt.err (!%p238_p7)
}
  0x10   :  { %s269_s16 = smov 64   ;;  %s270_s17 = smov 4  }
  0x11   :  { %19 = dma.hbm_to_vmem [thread:$0]  %s360_s0, 512, %s14_s7, [#allocation3], %s269_s16, %s269_s16, %s270_s17  }
  0x12   :  { %264 = dma.done.wait [#allocation3], 512  }
  0x13   :  { %265 = vsyncadd [#allocation3], 4294966784  ;;  %vm31_vm0 = vcmask 257024   ;;  %v23_v0 = vld [vmem:[#allocation2] sm:$0xf]  ;;  %vm184_vm1 = vcmask 1041409  }
  0x14   :  { %v24_v1 = vld [vmem:[#allocation2 + $0x4] sm:$0xf]  ;;  %v25_v2 = vld [vmem:[#allocation2 + $0x8] sm:$0xf]  ;;  %v26_v3 = vld [vmem:[#allocation2 + $0xc] sm:$0xf]  ;;  %v294_v6 = vmul.f32 %v23_v0, %v23_v0 }
  0x15   :  { %v27_v4 = vld [vmem:[#allocation2 + $0x10] sm:$0xf]  ;;  %v28_v5 = vld [vmem:[#allocation2 + $0x14] sm:$0xf]  ;;  %v296_v7 = vmul.f32 %v24_v1, %v24_v1  ;;  %v298_v8 = vmul.f32 %v25_v2, %v25_v2  ;;  %v29_v9 = vld [vmem:[#allocation2 + $0x18] sm:$0xf]  ;;  %v91_v12 = vmul.f32 %v26_v3, %v26_v3 }
  0x16   :  { %v32_v10 = vsel %vm31_vm0, %v23_v0, 0.0  ;;  %v39_v11 = vsel %vm31_vm0, %v24_v1, 0.0  ;;  %v302_v13 = vmul.f32 %v27_v4, %v27_v4  ;;  %v30_v14 = vld [vmem:[#allocation2 + $0x1c] sm:$0xf]  ;;  %v46_v17 = vsel %vm31_vm0, %v25_v2, 0.0  ;;  %s271_s0 = smov [#allocation5]  }
  0x17   :  { %v33_v15 = vrot.slane %v32_v10, 4  ;;  %v40_v16 = vrot.slane %v39_v11, 4  ;;  %v53_v18 = vsel %vm31_vm0, %v26_v3, 0.0  ;;  %v47_v19 = vrot.slane %v46_v17, 4  ;;  %s207_s20 = sshll.u32 %s271_s0, 4  ;;  %s208_s20 = int_to_ptr.vmem [resolvable:$true] %s207_s20 }
  0x18   :  { %v54_v20 = vrot.slane %v53_v18, 4  ;;  %v60_v21 = vsel %vm31_vm0, %v27_v4, 0.0  ;;  %v67_v22 = vsel %vm31_vm0, %v28_v5, 0.0  ;;  %v74_v29 = vsel %vm31_vm0, %v29_v9, 0.0  ;;  %s242_s21 = scalar_lea.vmem %s208_s20, 128  ;;  %p247_p9 = scmp.lt.s32.totalorder %s208_s20, %s208_s20 }
  0x19   :  { %v34_v23 = vadd.f32 %v33_v15, %v32_v10  ;;  %v41_v24 = vadd.f32 %v40_v16, %v39_v11  ;;  %v61_v25 = vrot.slane %v60_v21, 4  ;;  %v68_v26 = vrot.slane %v67_v22, 4  ;;  %p243_p8 = scmp.ne.s32.totalorder %s208_s20, %s242_s21  ;;  %p248_p10 = scmp.lt.s32.totalorder %s242_s21, %s242_s21 }
  0x1a   :  { %v48_v27 = vadd.f32 %v47_v19, %v46_v17  ;;  %v55_v28 = vadd.f32 %v54_v20, %v53_v18  ;;  %v81_v30 = vsel %vm31_vm0, %v30_v14, 0.0  ;;  %v75_v37 = vrot.slane %v74_v29, 4 }
  0x1b   :  { %v35_v31 = vrot.slane %v34_v23, 2  ;;  %v42_v32 = vrot.slane %v41_v24, 2  ;;  %v62_v33 = vadd.f32 %v61_v25, %v60_v21  ;;  %v69_v34 = vadd.f32 %v68_v26, %v67_v22  ;;  %p249_p11 = por %p248_p10, %p247_p9 }
  0x1c   :  { %v49_v35 = vrot.slane %v48_v27, 2  ;;  %v56_v36 = vrot.slane %v55_v28, 2  ;;  %v82_v38 = vrot.slane %v81_v30, 4  ;;  %v76_v45 = vadd.f32 %v75_v37, %v74_v29 }
  0x1d   :  { %v36_v39 = vadd.f32 %v35_v31, %v34_v23  ;;  %v43_v40 = vadd.f32 %v42_v32, %v41_v24  ;;  %v63_v41 = vrot.slane %v62_v33, 2  ;;  %v70_v42 = vrot.slane %v69_v34, 2  ;;  %p250_p12 = pnand %p249_p11, %p243_p8 }
  0x1e   :  { %v50_v43 = vadd.f32 %v49_v35, %v48_v27  ;;  %v57_v44 = vadd.f32 %v56_v36, %v55_v28  ;;  %v83_v46 = vadd.f32 %v82_v38, %v81_v30  ;;  %v77_v53 = vrot.slane %v76_v45, 2 }
  0x1f   :  { %v37_v47 = vrot.slane %v36_v39, 1  ;;  %v44_v48 = vrot.slane %v43_v40, 1  ;;  %v64_v49 = vadd.f32 %v63_v41, %v62_v33  ;;  %v71_v50 = vadd.f32 %v70_v42, %v69_v34 }
  0x20   :  { %v51_v51 = vrot.slane %v50_v43, 1  ;;  %v58_v52 = vrot.slane %v57_v44, 1  ;;  %v84_v54 = vrot.slane %v83_v46, 2  ;;  %v78_v61 = vadd.f32 %v77_v53, %v76_v45 }
  0x21   :  { %v310_v55 = vadd.f32 %v37_v47, %v36_v39  ;;  %v312_v56 = vadd.f32 %v44_v48, %v43_v40  ;;  %v65_v57 = vrot.slane %v64_v49, 1  ;;  %v72_v58 = vrot.slane %v71_v50, 1 }
  0x22   :  { %v314_v59 = vadd.f32 %v51_v51, %v50_v43  ;;  %v316_v60 = vadd.f32 %v58_v52, %v57_v44  ;;  %v85_v62 = vadd.f32 %v84_v54, %v83_v46  ;;  %v93_v1 = vmul.f32 %v28_v5, %v28_v5 }
  0x23   :  { %v318_v63 = vadd.f32 %v65_v57, %v64_v49  ;;  %v320_v0 = vadd.f32 %v72_v58, %v71_v50  ;;  %v94_v2 = vmul.f32 %v29_v9, %v29_v9  ;;  %v79_v3 = vrot.slane %v78_v61, 1 }
  0x24   :  { %v86_v4 = vrot.slane %v85_v62, 1  ;;  %v95_v10 = vmul.f32 %v30_v14, %v30_v14  ;;  %v96_v11 = vsel %vm31_vm0, %v294_v6, 0.0  ;;  %v103_v16 = vsel %vm31_vm0, %v296_v7, 0.0 }
  0x25   :  { %v97_v15 = vrot.slane %v96_v11, 4  ;;  %v110_v17 = vsel %vm31_vm0, %v298_v8, 0.0  ;;  %v117_v18 = vsel %vm31_vm0, %v91_v12, 0.0  ;;  %v80_v19 = vadd.f32 %v79_v3, %v78_v61 }
  0x26   :  { %v87_v20 = vadd.f32 %v86_v4, %v85_v62  ;;  %v104_v21 = vrot.slane %v103_v16, 4  ;;  %v111_v5 = vrot.slane %v110_v17, 4  ;;  %v118_v22 = vrot.slane %v117_v18, 4 }
  0x27   :  { %v98_v9 = vadd.f32 %v97_v15, %v96_v11  ;;  %v124_v14 = vsel %vm31_vm0, %v302_v13, 0.0  ;;  %v131_v6 = vsel %vm31_vm0, %v93_v1, 0.0  ;;  %v138_v8 = vsel %vm31_vm0, %v94_v2, 0.0 }
  0x28   :  { %v105_v23 = vadd.f32 %v104_v21, %v103_v16  ;;  %v112_v24 = vadd.f32 %v111_v5, %v110_v17  ;;  %v125_v25 = vrot.slane %v124_v14, 4  ;;  %v132_v7 = vrot.slane %v131_v6, 4 }
  0x29   :  { %v99_v26 = vrot.slane %v98_v9, 2  ;;  %v119_v27 = vadd.f32 %v118_v22, %v117_v18  ;;  %v145_v12 = vsel %vm31_vm0, %v95_v10, 0.0  ;;  %v139_v34 = vrot.slane %v138_v8, 4 }
  0x2a   :  { %v106_v28 = vrot.slane %v105_v23, 2  ;;  %v113_v29 = vrot.slane %v112_v24, 2  ;;  %v126_v30 = vadd.f32 %v125_v25, %v124_v14  ;;  %v133_v31 = vadd.f32 %v132_v7, %v131_v6 }
  0x2b   :  { %v100_v32 = vadd.f32 %v99_v26, %v98_v9  ;;  %v120_v33 = vrot.slane %v119_v27, 2  ;;  %v146_v13 = vrot.slane %v145_v12, 4  ;;  %v140_v41 = vadd.f32 %v139_v34, %v138_v8 }
  0x2c   :  { %v107_v35 = vadd.f32 %v106_v28, %v105_v23  ;;  %v114_v36 = vadd.f32 %v113_v29, %v112_v24  ;;  %v127_v37 = vrot.slane %v126_v30, 2  ;;  %v134_v38 = vrot.slane %v133_v31, 2 }
  0x2d   :  { %v101_v39 = vrot.slane %v100_v32, 1  ;;  %v121_v40 = vadd.f32 %v120_v33, %v119_v27  ;;  %v147_v42 = vadd.f32 %v146_v13, %v145_v12  ;;  %v141_v49 = vrot.slane %v140_v41, 2 }
  0x2e   :  { %v108_v43 = vrot.slane %v107_v35, 1  ;;  %v115_v44 = vrot.slane %v114_v36, 1  ;;  %v128_v45 = vadd.f32 %v127_v37, %v126_v30  ;;  %v135_v46 = vadd.f32 %v134_v38, %v133_v31 }
  0x2f   :  { %v102_v47 = vadd.f32 %v101_v39, %v100_v32  ;;  %v122_v48 = vrot.slane %v121_v40, 1  ;;  %v148_v50 = vrot.slane %v147_v42, 2  ;;  %vm186_vm2 = vcmask 1042434  }
  0x30   :  { %v109_v51 = vadd.f32 %v108_v43, %v107_v35  ;;  %v116_v52 = vadd.f32 %v115_v44, %v114_v36  ;;  %v129_v53 = vrot.slane %v128_v45, 1  ;;  %v136_v54 = vrot.slane %v135_v46, 1 }
  0x31   :  { %v123_v57 = vadd.f32 %v122_v48, %v121_v40  ;;  %v142_v58 = vadd.f32 %v141_v49, %v140_v41  ;;  %v149_v61 = vadd.f32 %v148_v50, %v147_v42  ;;  %v152_v62 = vmul.f32 %v310_v55, %v310_v55 }
  0x32   :  { %v130_v1 = vadd.f32 %v129_v53, %v128_v45  ;;  %v137_v2 = vadd.f32 %v136_v54, %v135_v46  ;;  %v153_v3 = vmul.f32 %v312_v56, %v312_v56  ;;  %v154_v4 = vmul.f32 %v314_v59, %v314_v59 }
  0x33   :  { %v143_v10 = vrot.slane %v142_v58, 1  ;;  %v150_v11 = vrot.slane %v149_v61, 1  ;;  %v155_v15 = vmul.f32 %v316_v60, %v316_v60  ;;  %v156_v16 = vmul.f32 %v318_v63, %v318_v63 }
  0x34   :  { %v157_v17 = vmul.f32 %v320_v0, %v320_v0  ;;  %v158_v55 = vmul.f32 %v80_v19, %v80_v19  ;;  %v159_v18 = vmul.f32 %v87_v20, %v87_v20  ;;  %v160_v21 = vsub.f32 %v152_v62, %v102_v47 }
  0x35   :  { %v144_v5 = vadd.f32 %v143_v10, %v142_v58  ;;  %v151_v9 = vadd.f32 %v150_v11, %v149_v61  ;;  %v161_v56 = vsub.f32 %v153_v3, %v109_v51  ;;  %v162_v22 = vsub.f32 %v154_v4, %v116_v52 }
  0x36   :  { %v163_v14 = vsub.f32 %v155_v15, %v123_v57  ;;  %v164_v59 = vsub.f32 %v156_v16, %v130_v1  ;;  %v165_v6 = vsub.f32 %v157_v17, %v137_v2  ;;  %v168_v23 = vmul.f32 0.5, %v160_v21 }
  0x37   :  { %v166_v24 = vsub.f32 %v158_v55, %v144_v5  ;;  %v167_v25 = vsub.f32 %v159_v18, %v151_v9  ;;  %v169_v60 = vmul.f32 0.5, %v161_v56  ;;  %v170_v7 = vmul.f32 0.5, %v162_v22 }
  0x38   :  { %v171_v26 = vmul.f32 0.5, %v163_v14  ;;  %v172_v63 = vmul.f32 0.5, %v164_v59  ;;  %vm188_vm3 = vcmask 1043459   ;;  %v173_v27 = vmul.f32 0.5, %v165_v6 }
  0x39   :  { %v185_v0 = vsel %vm184_vm1, %v169_v60, %v168_v23  ;;  %vm190_vm4 = vcmask 1044484   ;;  %v174_v19 = vmul.f32 0.5, %v166_v24  ;;  %vm192_vm5 = vcmask 1045509  }
  0x3a   :  { %v187_v20 = vsel %vm186_vm2, %v170_v7, %v185_v0  ;;  %v175_v8 = vmul.f32 0.5, %v167_v25  ;;  %vm194_vm6 = vcmask 1046534   ;;  %vm196_vm7 = vcmask 1047559  }
  0x3b   :  { %v189_v12 = vsel %vm188_vm3, %v171_v26, %v187_v20  ;;  %vm199_vm8 = vcmask 261120  }
  0x3c   :  { %v191_v28 = vsel %vm190_vm4, %v172_v63, %v189_v12 }
  0x3d   :  { %v193_v29 = vsel %vm192_vm5, %v173_v27, %v191_v28 }
  0x3e   :  { %v195_v30 = vsel %vm194_vm6, %v174_v19, %v193_v29 }
  0x3f   :  { %v197_v31 = vsel %vm196_vm7, %v175_v8, %v195_v30 }
  0x40   :  { %200 = vst.msk [vmem:[#allocation5] sm:$0xff] %vm199_vm8, %v197_v31 }
  0x41   :  { %253 = shalt.err (!%p250_p12)
}
  0x42   :  { %s254_s24 = scalar_lea.hbm %s361_s1, 128 }
  0x43   :  { %p255_p13 = scmp.ne.s32.totalorder %s361_s1, %s254_s24  ;;  %p258_p0 = scmp.lt.u32.totalorder %s254_s24, %s361_s1 }
  0x45   :  { %p260_p1 = pnand %p258_p0, %p255_p13 }
  0x47   :  { %263 = shalt.err (!%p260_p1)
}
  0x48   :  { %210 = dma.vmem_to_hbm [thread:$0]  %s208_s20, 128, %s361_s1, [#allocation4]  }
  0x49   :  { %266 = dma.done.wait [#allocation4], 128  }
  0x4a   :  { %267 = vsyncadd [#allocation4], 4294967168 }
  0x4b   :  { %214 = vsyncpa [#allocation3], 1 }
  0x4c   :  { %215 = vsyncpa [#allocation4], 1 }

</bundles_post_ra>
